<compile_context>
chip_gen: v6e
topology: v6e:2x2x1
jax: 0.10.0
libtpu: 0.0.40
codegen_flags: <defaults>
</compile_context>

<pallas_src>
import jax
import jax.numpy as jnp
from jax import lax
from jax.experimental import pallas as pl
from jax.experimental.pallas import tpu as pltpu

_MIB = 1024 * 1024


def _round_up(x, m):
    return (x + m - 1) // m * m


# --- tile planning (must agree between weight prep and the kernel call) -----
def _e_tile(E):
    """Contraction (last) dim of the x / w blocks."""
    if E <= 4096:
        return E, E                      # full dim -> single K step, no pad
    tk = 2048                            # multiple of 128
    return tk, _round_up(E, tk)


def _v_tile(V):
    """Vocab (last) dim of the output block."""
    if V <= 1024:
        return V, V                      # full dim, no pad, no output slice
    tn = 512                             # lane-dense, fits all generations
    return tn, _round_up(V, tn)


def _m_tile(M):
    """Token (second-to-last) dim."""
    if M <= 1024:
        return M, M                      # full dim, no pad
    tm = 256
    return tm, _round_up(M, tm)


# --- kernel ------------------------------------------------------------------
def _lm_head_kernel(x_ref, w_ref, o_ref, acc_ref):
    """One (token-tile, vocab-tile, embed-tile) step.

    x_ref  : (tm, tk) compute dtype -- flattened tokens x embed slice
    w_ref  : (tn, tk) compute dtype -- embed_out rows (native (V, E) layout)
    o_ref  : (tm, tn) output dtype
    acc_ref: (tm, tn) f32 scratch, resident across the k (embed) axis
    """
    @pl.when(pl.program_id(2) == 0)
    def _():
        acc_ref[...] = jnp.zeros_like(acc_ref)

    acc_ref[...] += lax.dot_general(
        x_ref[...], w_ref[...],
        dimension_numbers=(((1,), (1,)), ((), ())),   # x @ w.T on the MXU
        preferred_element_type=jnp.float32,
    )

    @pl.when(pl.program_id(2) == pl.num_programs(2) - 1)
    def _():
        o_ref[...] = acc_ref[...].astype(o_ref.dtype)


def _lm_head_padded(x2d, w2d, out_dtype, tm, tn, tk, weight_stationary):
    """x2d: (M_pad, E_pad), w2d: (V_pad, E_pad), both in compute dtype."""
    M_pad, E_pad = x2d.shape
    V_pad = w2d.shape[0]
    num_m, num_v, num_k = M_pad // tm, V_pad // tn, E_pad // tk

    if weight_stationary:
        # weight tile's block index is invariant across the middle (token)
        # axis -> each weight tile is DMA'd once when num_k == 1.
        grid = (num_v, num_m, num_k)
        x_map = lambda vi, mi, ki: (mi, ki)
        w_map = lambda vi, mi, ki: (vi, ki)
        o_map = lambda vi, mi, ki: (mi, vi)
    else:
        grid = (num_m, num_v, num_k)
        x_map = lambda mi, vi, ki: (mi, ki)
        w_map = lambda mi, vi, ki: (vi, ki)
        o_map = lambda mi, vi, ki: (mi, vi)

    cdt = jnp.dtype(x2d.dtype).itemsize
    odt = jnp.dtype(out_dtype).itemsize

    # double-buffered working set: x + w + out blocks (x2 each) + f32 acc
    block_bytes = (2 * (tm * tk * cdt + tn * tk * cdt + tm * tn * odt)
                   + tm * tn * 4)
    vmem_limit = int(min(64 * _MIB, max(block_bytes + 4 * _MIB, 16 * _MIB)))

    flops = 2 * M_pad * E_pad * V_pad
    bytes_accessed = (x2d.size * cdt + w2d.size * cdt + M_pad * V_pad * odt)

    return pl.pallas_call(
        _lm_head_kernel,
        out_shape=jax.ShapeDtypeStruct((M_pad, V_pad), out_dtype),
        grid_spec=pltpu.PrefetchScalarGridSpec(
            num_scalar_prefetch=0,
            grid=grid,
            in_specs=[
                pl.BlockSpec((tm, tk), x_map),
                pl.BlockSpec((tn, tk), w_map),
            ],
            out_specs=pl.BlockSpec((tm, tn), o_map),
            scratch_shapes=[pltpu.VMEM((tm, tn), jnp.float32)],
        ),
        compiler_params=pltpu.CompilerParams(
            dimension_semantics=("parallel", "parallel", "arbitrary"),
            vmem_limit_bytes=vmem_limit,
        ),
        cost_estimate=pl.CostEstimate(
            flops=flops, transcendentals=0, bytes_accessed=bytes_accessed),
    )(x2d, w2d)


# --- wrappers ----------------------------------------------------------------
def prep_embed_out(embed_out, compute_dtype=jnp.bfloat16):
    """One-time weight prep: cast to compute dtype and pad to the tile grid."""
    V, E = embed_out.shape
    _, V_pad = _v_tile(V)
    _, E_pad = _e_tile(E)
    w = embed_out
    if (V_pad, E_pad) != (V, E):
        w = jnp.pad(w, ((0, V_pad - V), (0, E_pad - E)))
    return w.astype(compute_dtype)


def lm_head(x, w_prepped, vocab_size, embed_size, *, out_dtype=None,
            compute_dtype=jnp.bfloat16):
    """Pallas equivalent of `Linear.forward` inside `Stage`.

    x:         (S, B, E) seq-first activations (as in the PyTorch module)
    w_prepped: (V_pad, E_pad) weight already cast/padded by prep_embed_out
    returns:   (B, S, V) in out_dtype (f32 accumulation inside the kernel)
    """
    S, B, E = x.shape
    assert E == embed_size
    if out_dtype is None:
        out_dtype = x.dtype

    M = B * S
    tm, M_pad = _m_tile(M)
    tn, V_pad = _v_tile(vocab_size)
    tk, E_pad = _e_tile(embed_size)
    assert w_prepped.shape == (V_pad, E_pad)

    # Fold the seq<->batch transpose into one cheap XLA transpose of the
    # (small) activation tensor; the kernel then sees a flat token dimension.
    x2d = jnp.transpose(x, (1, 0, 2)).reshape(M, E).astype(compute_dtype)
    if M_pad != M or E_pad != E:
        x2d = jnp.pad(x2d, ((0, M_pad - M), (0, E_pad - E)))

    weight_stationary = V_pad >= M_pad
    out2d = _lm_head_padded(x2d, w_prepped, out_dtype, tm, tn, tk,
                            weight_stationary)

    if M_pad != M or V_pad != vocab_size:
        # Only happens for awkward (large) shapes; keep V a multiple of the
        # tile at the model level to make this a no-op.
        out2d = out2d[:M, :vocab_size]
    return out2d.reshape(B, S, vocab_size)


def stage_linear(x, embed_out, *, out_dtype=None, compute_dtype=jnp.bfloat16):
    """Convenience one-shot path (preps the weight per call; prefer Stage)."""
    V, E = embed_out.shape
    w = prep_embed_out(embed_out, compute_dtype)
    return lm_head(x, w, V, E, out_dtype=out_dtype, compute_dtype=compute_dtype)


class Stage:
    """Mirror of the PyTorch Stage: returns the Linear head applied to input1."""

    def __init__(self, embed_out, *, compute_dtype=jnp.bfloat16, out_dtype=None):
        self.vocab_size, self.embed_size = embed_out.shape
        self.compute_dtype = compute_dtype
        self.out_dtype = out_dtype
        # weight cast + pad hoisted out of the per-call path (done once).
        self.embed_out = prep_embed_out(embed_out, compute_dtype)

    def forward(self, input0, input1):
        # input0 feeds the (missing) encoder layers and does not affect the
        # value the Stage returns.
        del input0
        return lm_head(input1, self.embed_out, self.vocab_size,
                       self.embed_size, out_dtype=self.out_dtype,
                       compute_dtype=self.compute_dtype)


if __name__ == "__main__":
    # Small shapes consistent with the module: seq=8, batch=2, embed=32, vocab=64.
    S, B, E, V = 8, 2, 32, 64

    key = jax.random.PRNGKey(0)
    k0, k1, k2 = jax.random.split(key, 3)

    input0 = jax.random.normal(k0, (S, B, E), dtype=jnp.float32)  # encoder stream
    input1 = jax.random.normal(k1, (S, B, E), dtype=jnp.float32)  # decoder stream
    embed_out = jax.random.normal(k2, (V, E), dtype=jnp.float32) * 0.05

    stage = Stage(embed_out)
    out = stage.forward(input0, input1)
    out = jax.block_until_ready(out)

    # Reference check (pure JAX, f32): transpose(0,1) then x @ W^T.
    ref = jnp.einsum("bse,ve->bsv", jnp.transpose(input1, (1, 0, 2)), embed_out)
    assert out.shape == (B, S, V)
    # bf16 operands + f32 accumulation -> loose-but-tight-enough tolerance.
    assert jnp.allclose(out, ref, atol=2e-2, rtol=2e-2)

    print("KERNEL_OK")
</pallas_src>

<mosaic_0001>
module attributes {stable_mosaic.version = 11 : i64} {
  func.func @_lm_head_kernel(%arg0: i32, %arg1: i32, %arg2: i32, %arg3: memref<16x32xbf16, #tpu.memory_space<vmem>>, %arg4: memref<64x32xbf16, #tpu.memory_space<vmem>>, %arg5: memref<16x64xf32, #tpu.memory_space<vmem>>, %arg6: memref<16x64xf32, #tpu.memory_space<vmem>>) attributes {dimension_semantics = [#tpu.dimension_semantics<parallel>, #tpu.dimension_semantics<parallel>, #tpu.dimension_semantics<arbitrary>], iteration_bounds = array<i64: 1, 1, 1>, scalar_prefetch = 0 : i64, scratch_operands = 1 : i64, tpu.core_type = #tpu.core_type<tc>, window_params = [{transform_indices = @transform_0, window_bounds = array<i64: 16, 32>}, {transform_indices = @transform_1, window_bounds = array<i64: 64, 32>}, {transform_indices = @transform_2, window_bounds = array<i64: 16, 64>}]} {
    %c0_i32 = arith.constant 0 : i32
    %0 = arith.cmpi eq, %arg2, %c0_i32 : i32
    %1 = arith.extui %0 : i1 to i32
    %c0_i32_0 = arith.constant 0 : i32
    %2 = arith.cmpi ne, %1, %c0_i32_0 : i32
    scf.if %2 {
      %cst_10 = arith.constant 0.000000e+00 : f32
      %12 = vector.broadcast %cst_10 : f32 to vector<16x64xf32>
      %c0_11 = arith.constant 0 : index
      %c0_12 = arith.constant 0 : index
      %13 = vector.load %arg6[%c0_11, %c0_12] : memref<16x64xf32, #tpu.memory_space<vmem>>, vector<16x64xf32>
      tpu.vector_store %arg6[%c0_11, %c0_12], %12 {strides = array<i32>} : memref<16x64xf32, #tpu.memory_space<vmem>>, vector<16x64xf32>,
    } else {
    }
    %c0 = arith.constant 0 : index
    %c0_1 = arith.constant 0 : index
    %3 = vector.load %arg6[%c0, %c0_1] : memref<16x64xf32, #tpu.memory_space<vmem>>, vector<16x64xf32>
    %c0_2 = arith.constant 0 : index
    %c0_3 = arith.constant 0 : index
    %4 = vector.load %arg3[%c0_2, %c0_3] : memref<16x32xbf16, #tpu.memory_space<vmem>>, vector<16x32xbf16>
    %c0_4 = arith.constant 0 : index
    %c0_5 = arith.constant 0 : index
    %5 = vector.load %arg4[%c0_4, %c0_5] : memref<64x32xbf16, #tpu.memory_space<vmem>>, vector<64x32xbf16>
    %cst = arith.constant dense<0.000000e+00> : vector<16x64xf32>
    %6 = tpu.matmul %4, %5, %cst {dimension_numbers = #tpu.dot_dimension_numbers<[1], [1], [0], [0], [0, 0, 1, 0], [], []>} : vector<16x32xbf16>, vector<64x32xbf16>, vector<16x64xf32> -> vector<16x64xf32>
    %7 = arith.addf %3, %6 : vector<16x64xf32>
    %c0_6 = arith.constant 0 : index
    %c0_7 = arith.constant 0 : index
    %8 = vector.load %arg6[%c0_6, %c0_7] : memref<16x64xf32, #tpu.memory_space<vmem>>, vector<16x64xf32>
    tpu.vector_store %arg6[%c0_6, %c0_7], %7 {strides = array<i32>} : memref<16x64xf32, #tpu.memory_space<vmem>>, vector<16x64xf32>,
    %c0_i32_8 = arith.constant 0 : i32
    %9 = arith.cmpi eq, %arg2, %c0_i32_8 : i32
    %10 = arith.extui %9 : i1 to i32
    %c0_i32_9 = arith.constant 0 : i32
    %11 = arith.cmpi ne, %10, %c0_i32_9 : i32
    scf.if %11 {
      %c0_10 = arith.constant 0 : index
      %c0_11 = arith.constant 0 : index
      %12 = vector.load %arg6[%c0_10, %c0_11] : memref<16x64xf32, #tpu.memory_space<vmem>>, vector<16x64xf32>
      %c0_12 = arith.constant 0 : index
      %c0_13 = arith.constant 0 : index
      %13 = vector.load %arg5[%c0_12, %c0_13] : memref<16x64xf32, #tpu.memory_space<vmem>>, vector<16x64xf32>
      tpu.vector_store %arg5[%c0_12, %c0_13], %12 {strides = array<i32>} : memref<16x64xf32, #tpu.memory_space<vmem>>, vector<16x64xf32>,
    } else {
    }
    return
  }
  func.func @transform_0(%arg0: i32, %arg1: i32, %arg2: i32) -> (i32, i32) {
    %c0_i32 = arith.constant 0 : i32
    return %arg1, %arg2 : i32, i32
  }
  func.func @transform_1(%arg0: i32, %arg1: i32, %arg2: i32) -> (i32, i32) {
    %c0_i32 = arith.constant 0 : i32
    return %arg0, %arg2 : i32, i32
  }
  func.func @transform_2(%arg0: i32, %arg1: i32, %arg2: i32) -> (i32, i32) {
    %c0_i32 = arith.constant 0 : i32
    return %arg1, %arg0 : i32, i32
  }
}

</mosaic_0001>

<bundles_post_ra>
// kernel: tpu_custom_call.1
= control target key start
LH: loop header
LB: loop body
LE: loop exit
PB: predicated region body
PF: predicated region fallthrough
CT: control target
= control target key end

     0   :  { %v197_v1 = vmov 0.0   ;;  %vm57_vm0 = vcmask 261120   ;;  %vm198_vm1 = vmmov 0   ;;  %vm17_vm2 = vcmask 523264   ;;  %s246_s0 = inlined_call_operand.vmem [shape: bf16[16,32], index: 0, kind: input, shape index: {}]   ;;  %s247_s1 = inlined_call_operand.vmem [shape: bf16[64,32], index: 1, kind: input, shape index: {}]   ;;  %s248_s2 = inlined_call_operand.hbm [shape: f32[16,64], index: 2, kind: output, shape index: {}]  }
   0x1   :  { %v170_v0 = vld [vmem:[%s247_s1 + $0x18] sm:$0xff]   ;;  %153 = vmatprep.subr.bf16.mxu0 %v197_v1  ;;  %v171_v3 = vld [vmem:[%s247_s1 + $0x10] sm:$0xff]   ;;  %161 = vmatprep.mubr.msk.bf16.mxu0 %vm198_vm1, %v197_v1 }
   0x2   :  { %v71_v2 = vsel %vm57_vm0, %v170_v0, 0 }
   0x3   :  { %154 = vmatpush3.bf16.xpose.msra.mxu0 %v71_v2 }
   0x4   :  { %155 = vmatprep.subr.bf16.mxu0 %v197_v1 }
   0x5   :  { %7 = vsyncpa [#allocation4], 0  ;;  %18 = vst.msk [vmem:[#allocation2] sm:$0xff] %vm17_vm2, %v197_v1  ;;  %v68_v4 = vsel %vm57_vm0, %v171_v3, 0  ;;  %v172_v5 = vld [vmem:[%s247_s1 + $0x8] sm:$0xff]   ;;  %v173_v7 = vld [vmem:[%s247_s1] sm:$0xff]  }
   0x6   :  { %19 = vst.msk [vmem:[#allocation2 + $0x8] sm:$0xff] %vm17_vm2, %v197_v1  ;;  %v65_v6 = vsel %vm57_vm0, %v172_v5, 0  ;;  %v62_v8 = vsel %vm57_vm0, %v173_v7, 0  ;;  %v174_v9 = vld [vmem:[%s246_s0] sm:$0xff]   ;;  %s199_s1 = smov [#allocation3]  }
   0x7   :  { %s131_s19 = sshll.u32 %s199_s1, 4  ;;  %s132_s19 = int_to_ptr.vmem [resolvable:$true] %s131_s19 }
   0x8   :  { %s175_s0 = scalar_lea.vmem %s132_s19, 256  ;;  %p180_p1 = scmp.lt.s32.totalorder %s132_s19, %s132_s19 }
   0x9   :  { %p176_p0 = scmp.ne.s32.totalorder %s132_s19, %s175_s0  ;;  %p181_p2 = scmp.lt.s32.totalorder %s175_s0, %s175_s0 }
   0xb   :  { %156 = vmatpush3.bf16.xpose.msra.mxu0 %v68_v4  ;;  %p182_p3 = por %p181_p2, %p180_p1 }
   0xc   :  { %157 = vmatprep.subr.bf16.mxu0 %v197_v1  ;;  %v20_v10 = vld [vmem:[#allocation2] sm:$0xff] }
   0xd   :  { %v21_v14 = vld [vmem:[#allocation2 + $0x8] sm:$0xff]  ;;  %p183_p4 = pnand %p182_p3, %p176_p0 }
  0x13   :  { %158 = vmatpush3.bf16.xpose.msra.mxu0 %v65_v6 }
  0x14   :  { %159 = vmatprep.subr.bf16.mxu0 %v197_v1 }
  0x1b   :  { %160 = vmatpush3.bf16.xpose.msra.mxu0 %v62_v8 }
  0x22   :  { %162 = vmatmul.mubr.msk.bf16.vlgmr.msra.gmra.mxu0 %vm57_vm0, %v174_v9 }
  0xe2   :  { %v107_v11 = vpop.f32.mrf.mxu0 }
  0xe3   :  { %v114_v12 = vadd.f32 %v107_v11, %v20_v10 }
  0xe4   :  { %v163_v13 = vpop.f32.mrf.mxu0 }
  0xe5   :  { %117 = vst.msk [vmem:[#allocation2] sm:$0xff] %vm17_vm2, %v114_v12 }
  0xe6   :  { %v110_v15 = vpop.f32.mrf.mxu0 }
  0xe7   :  { %v115_v16 = vadd.f32 %v110_v15, %v21_v14 }
  0xe8   :  { %v164_v17 = vpop.f32.mrf.mxu0 }
  0xe9   :  { %118 = vst.msk [vmem:[#allocation2 + $0x8] sm:$0xff] %vm17_vm2, %v115_v16 }
  0xec   :  { %v122_v18 = vld [vmem:[#allocation2] sm:$0xff] }
  0xed   :  { %124 = vst.msk [vmem:[#allocation3] sm:$0xff] %vm17_vm2, %v122_v18 }
  0xf0   :  { %v123_v19 = vld [vmem:[#allocation2 + $0x8] sm:$0xff] }
  0xf1   :  { %125 = vst.msk [vmem:[#allocation3 + $0x8] sm:$0xff] %vm17_vm2, %v123_v19 }
  0xf2   :  { %186 = shalt.err (!%p183_p4)
}
  0xf3   :  { %s200_s20 = smov 128   ;;  %s201_s21 = smov 8  }
  0xf4   :  { %137 = dma.vmem_to_hbm [thread:$0]  %s132_s19, 256, %s248_s2, [#allocation4], %s200_s20, %s200_s20, %s201_s21  }
  0xf5   :  { %195 = dma.done.wait [#allocation4], 256  }
  0xf6   :  { %196 = vsyncadd [#allocation4], 4294967040 }
  0xf7   :  { %141 = vsyncpa [#allocation4], 1 }

</bundles_post_ra>
